<compile_context>
chip_gen: v7x
topology: tpu7x:2x2x1
jax: 0.10.0
libtpu: 0.0.40
codegen_flags: <defaults>
</compile_context>

<pallas_src>
import jax
import jax.numpy as jnp
from jax.experimental import pallas as pl
from jax.experimental.pallas import tpu as pltpu


def _feature_kernel(x_ref, o_ref):
    # x_ref block is (2, tr, lane): x1 = plane 0, x2 = plane 1.
    x1 = x_ref[0]
    x2 = x_ref[1]
    o_ref[...] = (1.0 - x1 * x1) * (1.0 - x2 * x2)


def my_feature(x, *, lane=1024, block_rows=256, small_n_threshold=65536):
    """x: (N, 2) with columns [x1, x2] -> (N, 1) feature 'k0'."""
    N, F = x.shape
    assert F == 2, "expects exactly the two columns ['x1', 'x2']"
    assert lane % 128 == 0 and lane >= 128, "lane width must be a multiple of 128"
    dtype = x.dtype

    # --- Small-N fast path: let XLA fuse this 4-flop feature into the
    # --- consumer graph; kernel launch + layout reorg would dominate.
    if N < small_n_threshold:
        x1 = x[:, 0:1]
        x2 = x[:, 1:2]
        return (1.0 - x1 * x1) * (1.0 - x2 * x2)

    # --- Tile selection ---------------------------------------------------
    # Clamp tiny row tiles (per-step overhead dominates below ~64 rows).
    block_rows = max(64, (block_rows // 8) * 8)

    R = -(-N // lane)                     # rows needed at lane width
    R8 = max(8, ((R + 7) // 8) * 8)       # pad rows to a multiple of 8 sublanes

    if R8 < 16:
        tr = R8                           # too few rows to split across cores
    elif R8 <= 2 * block_rows:
        # Exactly two blocks so both v7x TensorCores get work.
        tr = ((R8 // 2 + 7) // 8) * 8
    else:
        tr = block_rows
    Rp = ((R8 + tr - 1) // tr) * tr       # padded rows, multiple of the tile
    padded = Rp * lane

    # --- One fused pad + transpose + reshape: (N,2) -> (2, Rp, lane) --------
    xs = x
    if padded != N:
        xs = jnp.pad(xs, ((0, padded - N), (0, 0)))  # pad value sliced away later
    xs = xs.T.reshape(2, Rp, lane)

    out = pl.pallas_call(
        _feature_kernel,
        out_shape=jax.ShapeDtypeStruct((Rp, lane), dtype),
        grid_spec=pl.GridSpec(
            grid=(Rp // tr,),
            in_specs=[pl.BlockSpec((2, tr, lane), lambda i: (0, i, 0))],
            out_specs=pl.BlockSpec((tr, lane), lambda i: (i, 0)),
        ),
        compiler_params=pltpu.CompilerParams(
            dimension_semantics=("parallel",),
        ),
        cost_estimate=pl.CostEstimate(
            flops=4 * padded,
            transcendentals=0,
            bytes_accessed=3 * padded * dtype.itemsize,
        ),
    )(xs)

    # Back to the (N, 1) LabelTensor-style column layout.
    return out.reshape(-1)[:N].reshape(N, 1)


def _ref(x):
    x1 = x[:, 0:1]
    x2 = x[:, 1:2]
    return (1.0 - x1 ** 2) * (1.0 - x2 ** 2)


if __name__ == "__main__":
    key = jax.random.PRNGKey(0)

    # Small, ragged set of collocation points in [-1, 1]^2.
    # Exercise both the jnp fast path and the forced-kernel path.
    N = 200
    x = jax.random.uniform(key, (N, 2), dtype=jnp.float32, minval=-1.0, maxval=1.0)
    ref = _ref(x)
    out_fast = jax.block_until_ready(my_feature(x))                        # fast path
    out_kern = jax.block_until_ready(my_feature(x, small_n_threshold=0))   # kernel path
    assert out_fast.shape == (N, 1) and out_kern.shape == (N, 1)
    assert jnp.allclose(out_fast, ref, atol=1e-6), "mismatch (fast path)"
    assert jnp.allclose(out_kern, ref, atol=1e-6), "mismatch (kernel, single block)"

    # Medium N: kernel path with a 2-block grid (v7x megacore sharding).
    key2 = jax.random.PRNGKey(1)
    N2 = 20_000
    x2 = jax.random.uniform(key2, (N2, 2), dtype=jnp.float32, minval=-1.0, maxval=1.0)
    out2 = jax.block_until_ready(my_feature(x2, small_n_threshold=0))
    assert out2.shape == (N2, 1)
    assert jnp.allclose(out2, _ref(x2), atol=1e-6), "mismatch (2-block grid)"

    # Larger N: multi-block grid with the default tile size.
    key3 = jax.random.PRNGKey(2)
    N3 = 600_000
    x3 = jax.random.uniform(key3, (N3, 2), dtype=jnp.float32, minval=-1.0, maxval=1.0)
    out3 = jax.block_until_ready(my_feature(x3))
    assert out3.shape == (N3, 1)
    assert jnp.allclose(out3, _ref(x3), atol=1e-6), "mismatch (multi-block grid)"

    print("KERNEL_OK")
</pallas_src>

<mosaic_0001>
module attributes {stable_mosaic.version = 11 : i64} {
  func.func @_feature_kernel(%arg0: i32, %arg1: memref<2x8x1024xf32, #tpu.memory_space<vmem>>, %arg2: memref<8x1024xf32, #tpu.memory_space<vmem>>) attributes {dimension_semantics = [#tpu.dimension_semantics<parallel>], iteration_bounds = array<i64: 1>, scalar_prefetch = 0 : i64, scratch_operands = 0 : i64, tpu.core_type = #tpu.core_type<tc>, window_params = [{transform_indices = @transform_0, window_bounds = array<i64: 2, 8, 1024>}, {transform_indices = @transform_1, window_bounds = array<i64: 8, 1024>}]} {
    %c0 = arith.constant 0 : index
    %c0_0 = arith.constant 0 : index
    %c0_1 = arith.constant 0 : index
    %0 = vector.load %arg1[%c0, %c0_0, %c0_1] : memref<2x8x1024xf32, #tpu.memory_space<vmem>>, vector<1x8x1024xf32>
    %1 = vector.shape_cast %0 : vector<1x8x1024xf32> to vector<8x1024xf32>
    %c1 = arith.constant 1 : index
    %c0_2 = arith.constant 0 : index
    %c0_3 = arith.constant 0 : index
    %2 = vector.load %arg1[%c1, %c0_2, %c0_3] : memref<2x8x1024xf32, #tpu.memory_space<vmem>>, vector<1x8x1024xf32>
    %3 = vector.shape_cast %2 : vector<1x8x1024xf32> to vector<8x1024xf32>
    %4 = arith.mulf %1, %1 : vector<8x1024xf32>
    %cst = arith.constant 1.000000e+00 : f32
    %5 = vector.broadcast %cst : f32 to vector<8x1024xf32>
    %6 = arith.subf %5, %4 : vector<8x1024xf32>
    %7 = arith.mulf %3, %3 : vector<8x1024xf32>
    %cst_4 = arith.constant 1.000000e+00 : f32
    %8 = vector.broadcast %cst_4 : f32 to vector<8x1024xf32>
    %9 = arith.subf %8, %7 : vector<8x1024xf32>
    %10 = arith.mulf %6, %9 : vector<8x1024xf32>
    %c0_5 = arith.constant 0 : index
    %c0_6 = arith.constant 0 : index
    %11 = vector.load %arg2[%c0_5, %c0_6] : memref<8x1024xf32, #tpu.memory_space<vmem>>, vector<8x1024xf32>
    tpu.vector_store %arg2[%c0_5, %c0_6], %10 {strides = array<i32>} : memref<8x1024xf32, #tpu.memory_space<vmem>>, vector<8x1024xf32>,
    return
  }
  func.func @transform_0(%arg0: i32) -> (i32, i32, i32) {
    %c0_i32 = arith.constant 0 : i32
    %c0_i32_0 = arith.constant 0 : i32
    %c0_i32_1 = arith.constant 0 : i32
    return %c0_i32, %arg0, %c0_i32_0 : i32, i32, i32
  }
  func.func @transform_1(%arg0: i32) -> (i32, i32) {
    %c0_i32 = arith.constant 0 : i32
    %c0_i32_0 = arith.constant 0 : i32
    return %arg0, %c0_i32 : i32, i32
  }
}

</mosaic_0001>

<bundles_post_ra>
// kernel: tpu_custom_call.1
= control target key start
LH: loop header
LB: loop body
LE: loop exit
PB: predicated region body
PF: predicated region fallthrough
CT: control target
= control target key end

     0   :  { %6 = vsyncpa [#allocation3], 0  ;;  %s193_s0 = inlined_call_operand.hbm [shape: f32[2,8,1024], index: 0, kind: input, shape index: {}]   ;;  %s194_s1 = inlined_call_operand.hbm [shape: f32[8,1024], index: 1, kind: output, shape index: {}]  }
   0x1   :  { %7 = vsyncpa [#allocation4], 0  ;;  %s155_s6 = smov [#allocation2]   ;;  %s107_s10 = scalar_lea.hbm %s193_s0, 2048 }
   0x2   :  { %s13_s7 = sshll.u32 %s155_s6, 4  ;;  %p108_p0 = scmp.ne.s32.totalorder %s193_s0, %s107_s10  ;;  %s14_s7 = int_to_ptr.vmem [resolvable:$true] %s13_s7 }
   0x3   :  { %p111_p1 = scmp.lt.u32.totalorder %s107_s10, %s193_s0 }
   0x5   :  { %p113_p2 = pnand %p111_p1, %p108_p0 }
   0x7   :  { %116 = shalt.err (!%p113_p2)
}
   0x8   :  { %s117_s15 = scalar_lea.vmem %s14_s7, 2048  ;;  %p122_p4 = scmp.lt.s32.totalorder %s14_s7, %s14_s7 }
   0x9   :  { %p118_p3 = scmp.ne.s32.totalorder %s14_s7, %s117_s15  ;;  %p123_p5 = scmp.lt.s32.totalorder %s117_s15, %s117_s15 }
   0xb   :  { %p124_p6 = por %p123_p5, %p122_p4 }
   0xd   :  { %p125_p7 = pnand %p124_p6, %p118_p3 }
   0xf   :  { %128 = shalt.err (!%p125_p7)
}
  0x10   :  { %s156_s16 = smov 1024   ;;  %s157_s17 = smov 64  }
  0x11   :  { %19 = dma.hbm_to_vmem [thread:$0]  %s193_s0, 2048, %s14_s7, [#allocation3], %s156_s16, %s156_s16, %s157_s17  }
  0x12   :  { %151 = dma.done.wait [#allocation3], 2048  }
  0x13   :  { %152 = vsyncadd [#allocation3], 4294965248  ;;  %v23_v0 = vld [vmem:[#allocation2] sm:$0xff]  ;;  %v24_v2 = vld [vmem:[#allocation2 + $0x8] sm:$0xff]  ;;  %s158_s0 = smov [#allocation5]  }
  0x14   :  { %v32_v1 = vld [vmem:[#allocation2 + $0x40] sm:$0xff]  ;;  %v40_v3 = vmul.f32 %v23_v0, %v23_v0  ;;  %v33_v5 = vld [vmem:[#allocation2 + $0x48] sm:$0xff]  ;;  %v41_v6 = vmul.f32 %v24_v2, %v24_v2  ;;  %v25_v7 = vld [vmem:[#allocation2 + $0x10] sm:$0xff]  ;;  %s94_s20 = sshll.u32 %s158_s0, 4  ;;  %s95_s20 = int_to_ptr.vmem [resolvable:$true] %s94_s20 }
  0x15   :  { %v56_v4 = vmul.f32 %v32_v1, %v32_v1  ;;  %v34_v8 = vld [vmem:[#allocation2 + $0x50] sm:$0xff]  ;;  %v57_v9 = vmul.f32 %v33_v5, %v33_v5  ;;  %v42_v10 = vmul.f32 %v25_v7, %v25_v7  ;;  %v26_v12 = vld [vmem:[#allocation2 + $0x18] sm:$0xff]  ;;  %v27_v14 = vld [vmem:[#allocation2 + $0x20] sm:$0xff]  ;;  %s129_s21 = scalar_lea.vmem %s95_s20, 1024  ;;  %p134_p9 = scmp.lt.s32.totalorder %s95_s20, %s95_s20 }
  0x16   :  { %v58_v11 = vmul.f32 %v34_v8, %v34_v8  ;;  %v35_v13 = vld [vmem:[#allocation2 + $0x58] sm:$0xff]  ;;  %v48_v15 = vsub.f32 1.0, %v40_v3  ;;  %v49_v17 = vsub.f32 1.0, %v41_v6  ;;  %v43_v18 = vmul.f32 %v26_v12, %v26_v12  ;;  %v36_v19 = vld [vmem:[#allocation2 + $0x60] sm:$0xff]  ;;  %v28_v20 = vld [vmem:[#allocation2 + $0x28] sm:$0xff]  ;;  %p130_p8 = scmp.ne.s32.totalorder %s95_s20, %s129_s21  ;;  %p135_p10 = scmp.lt.s32.totalorder %s129_s21, %s129_s21 }
  0x17   :  { %v64_v16 = vsub.f32 1.0, %v56_v4  ;;  %v65_v21 = vsub.f32 1.0, %v57_v9  ;;  %v50_v22 = vsub.f32 1.0, %v42_v10  ;;  %v59_v24 = vmul.f32 %v35_v13, %v35_v13  ;;  %v37_v25 = vld [vmem:[#allocation2 + $0x68] sm:$0xff]  ;;  %v29_v26 = vld [vmem:[#allocation2 + $0x30] sm:$0xff]  ;;  %v30_v32 = vld [vmem:[#allocation2 + $0x38] sm:$0xff] }
  0x18   :  { %v66_v23 = vsub.f32 1.0, %v58_v11  ;;  %v51_v28 = vsub.f32 1.0, %v43_v18  ;;  %v44_v29 = vmul.f32 %v27_v14, %v27_v14  ;;  %v60_v30 = vmul.f32 %v36_v19, %v36_v19  ;;  %v38_v31 = vld [vmem:[#allocation2 + $0x70] sm:$0xff]  ;;  %v39_v37 = vld [vmem:[#allocation2 + $0x78] sm:$0xff]  ;;  %p136_p11 = por %p135_p10, %p134_p9 }
  0x19   :  { %v72_v27 = vmul.f32 %v64_v16, %v48_v15  ;;  %v73_v33 = vmul.f32 %v65_v21, %v49_v17  ;;  %v67_v35 = vsub.f32 1.0, %v59_v24  ;;  %v45_v36 = vmul.f32 %v28_v20, %v28_v20 }
  0x1a   :  { %v74_v34 = vmul.f32 %v66_v23, %v50_v22  ;;  %v52_v38 = vsub.f32 1.0, %v44_v29  ;;  %v68_v39 = vsub.f32 1.0, %v60_v30  ;;  %v61_v40 = vmul.f32 %v37_v25, %v37_v25  ;;  %p137_p12 = pnand %p136_p11, %p130_p8 }
  0x1b   :  { %80 = vst [vmem:[#allocation5] sm:$0xff] %v72_v27  ;;  %v46_v41 = vmul.f32 %v29_v26, %v29_v26  ;;  %81 = vst [vmem:[#allocation5 + $0x8] sm:$0xff] %v73_v33  ;;  %v75_v42 = vmul.f32 %v67_v35, %v51_v28  ;;  %v53_v43 = vsub.f32 1.0, %v45_v36  ;;  %v62_v44 = vmul.f32 %v38_v31, %v38_v31 }
  0x1c   :  { %82 = vst [vmem:[#allocation5 + $0x10] sm:$0xff] %v74_v34  ;;  %v47_v45 = vmul.f32 %v30_v32, %v30_v32  ;;  %v76_v46 = vmul.f32 %v68_v39, %v52_v38  ;;  %v69_v47 = vsub.f32 1.0, %v61_v40  ;;  %v63_v49 = vmul.f32 %v39_v37, %v39_v37 }
  0x1d   :  { %v54_v48 = vsub.f32 1.0, %v46_v41  ;;  %83 = vst [vmem:[#allocation5 + $0x18] sm:$0xff] %v75_v42  ;;  %v70_v50 = vsub.f32 1.0, %v62_v44 }
  0x1e   :  { %v55_v51 = vsub.f32 1.0, %v47_v45  ;;  %84 = vst [vmem:[#allocation5 + $0x20] sm:$0xff] %v76_v46  ;;  %v77_v52 = vmul.f32 %v69_v47, %v53_v43  ;;  %v71_v53 = vsub.f32 1.0, %v63_v49 }
  0x1f   :  { %v78_v54 = vmul.f32 %v70_v50, %v54_v48 }
  0x20   :  { %85 = vst [vmem:[#allocation5 + $0x28] sm:$0xff] %v77_v52  ;;  %v79_v55 = vmul.f32 %v71_v53, %v55_v51 }
  0x21   :  { %86 = vst [vmem:[#allocation5 + $0x30] sm:$0xff] %v78_v54 }
  0x22   :  { %87 = vst [vmem:[#allocation5 + $0x38] sm:$0xff] %v79_v55 }
  0x23   :  { %140 = shalt.err (!%p137_p12)
}
  0x24   :  { %s141_s24 = scalar_lea.hbm %s194_s1, 1024 }
  0x25   :  { %p142_p13 = scmp.ne.s32.totalorder %s194_s1, %s141_s24  ;;  %p145_p0 = scmp.lt.u32.totalorder %s141_s24, %s194_s1 }
  0x27   :  { %p147_p1 = pnand %p145_p0, %p142_p13 }
  0x29   :  { %150 = shalt.err (!%p147_p1)
}
  0x2a   :  { %97 = dma.vmem_to_hbm [thread:$0]  %s95_s20, 1024, %s194_s1, [#allocation4]  }
  0x2b   :  { %153 = dma.done.wait [#allocation4], 1024  }
  0x2c   :  { %154 = vsyncadd [#allocation4], 4294966272 }
  0x2d   :  { %101 = vsyncpa [#allocation3], 1 }
  0x2e   :  { %102 = vsyncpa [#allocation4], 1 }

</bundles_post_ra>
